<compile_context>
chip_gen: v5e
topology: v5e:2x2
jax: 0.10.0
libtpu: 0.0.40
codegen_flags: <defaults>
</compile_context>

<pallas_src>
import functools

import jax
import jax.numpy as jnp
from jax.experimental import pallas as pl
from jax.experimental.pallas import tpu as pltpu


def _vmem_caps():
    """(tile budget, scoped vmem limit cap) picked per TPU generation."""
    try:
        cap = int(pltpu.get_tpu_info().vmem_capacity_bytes)
    except Exception:
        cap = 64 << 20  # conservative (v7x-sized) fallback
    if cap > (96 << 20):          # v5e / v6e: 128 MiB physical VMEM
        return 80 << 20, 100 << 20
    return 40 << 20, 48 << 20     # v7x (64 MiB per TensorCore) or unknown


# --------------------------------------------------------------------------
# 4-D (N, C, H, W) path
# --------------------------------------------------------------------------
def _fitnet_kernel_4d(s_ref, w_ref, t_ref, out_ref, acc_ref, *,
                      n_split, tiles_per_split, hw_tile, length,
                      fold, needs_mask):
    o = pl.program_id(0)          # fused (batch, core-split) axis
    j = pl.program_id(1)          # spatial-tile (reduction) axis

    @pl.when(j == 0)
    def _():
        acc_ref[...] = jnp.zeros_like(acc_ref)

    # 1x1 conv on this spatial tile: (Cout, Cin) @ (Cin, hw_tile) on the MXU.
    proj = jnp.dot(w_ref[...], s_ref[...], preferred_element_type=jnp.float32)
    diff = proj - t_ref[...].astype(jnp.float32)
    sq = diff * diff

    if fold:
        # Fold Cout over sublane groups of 8 (pure VALU vreg adds) so the
        # accumulator read-modify-write is only (8, hw_tile).
        cout = sq.shape[0]
        sq = sq.reshape(cout // 8, 8, sq.shape[-1]).sum(axis=0)

    if needs_mask:
        # Ragged spatial tail: zero lanes past the true length (no wrapper pad).
        if n_split == 1:
            tile_idx = j
        else:
            tile_idx = (o % n_split) * tiles_per_split + j
        lane_idx = tile_idx * hw_tile + jax.lax.broadcasted_iota(
            jnp.int32, sq.shape, sq.ndim - 1)
        sq = jnp.where(lane_idx < length, sq, 0.0)

    acc_ref[...] += sq            # elementwise accumulate, VALU only

    @pl.when(j == pl.num_programs(1) - 1)
    def _():
        total = jnp.sum(acc_ref[...])        # one cross-lane reduce per row
        out_ref[...] = jnp.broadcast_to(total, out_ref.shape).astype(jnp.float32)


def _fitnet_loss_4d(student, teacher, weight, tile_hw, vmem_budget):
    n, cin, h, w = student.shape
    cout = teacher.shape[1]
    length = h * w

    s3 = student.reshape(n, cin, length)     # metadata-only reshapes
    t3 = teacher.reshape(n, cout, length)
    w_mat = weight.reshape(cout, cin).astype(s3.dtype)

    total_count = n * cout * length
    lane = 128

    # Spatial tile: full dim when tiny, otherwise a multiple of 128 that never
    # exceeds the array dim (ragged tail handled by in-kernel masking).
    if length <= lane:
        hw_tile = length
    else:
        hw_tile = min(pl.cdiv(int(tile_hw), lane) * lane,
                      (length // lane) * lane)

    fold = (cout > 8) and (cout % 8 == 0)
    acc_rows = 8 if fold else cout

    s_item = jnp.dtype(s3.dtype).itemsize
    t_item = jnp.dtype(t3.dtype).itemsize

    def _vmem_bytes(t):
        return (2 * cin * t * s_item        # double-buffered student tile
                + 2 * cout * t * t_item     # double-buffered teacher tile
                + 4 * acc_rows * t          # f32 accumulator scratch
                + 2 * cout * cin * s_item   # weight (2 bufs)
                + 2 * 8 * lane * 4)         # output block (2 bufs)

    budget, limit_cap = _vmem_caps()
    if vmem_budget is not None:
        budget = int(vmem_budget)
    while hw_tile > lane and _vmem_bytes(hw_tile) > budget:
        hw_tile = max(lane, (hw_tile // 2 // lane) * lane)

    total_tiles = pl.cdiv(length, hw_tile)
    needs_mask = (total_tiles * hw_tile != length)

    # If a single image can't feed both v7x TensorCores through the batch
    # axis, split the spatial tile range across a second "parallel" slot.
    n_split = 1
    if n == 1 and total_tiles >= 2 and total_tiles % 2 == 0:
        n_split = 2
    tiles_per_split = total_tiles // n_split

    grid = (n * n_split, tiles_per_split)
    vmem_limit = int(min(max(2 * _vmem_bytes(hw_tile), 32 << 20), limit_cap))

    if n_split == 1:
        data_map = lambda o, j: (o, 0, j)
    else:
        data_map = lambda o, j: (o // n_split, 0,
                                 (o % n_split) * tiles_per_split + j)

    kernel = functools.partial(
        _fitnet_kernel_4d,
        n_split=n_split, tiles_per_split=tiles_per_split,
        hw_tile=hw_tile, length=length,
        fold=fold, needs_mask=needs_mask)

    out = pl.pallas_call(
        kernel,
        out_shape=jax.ShapeDtypeStruct((n * n_split, 8, lane), jnp.float32),
        grid_spec=pltpu.PrefetchScalarGridSpec(
            num_scalar_prefetch=0,
            grid=grid,
            in_specs=[
                pl.BlockSpec((None, cin, hw_tile), data_map),
                pl.BlockSpec((cout, cin), lambda o, j: (0, 0)),
                pl.BlockSpec((None, cout, hw_tile), data_map),
            ],
            out_specs=pl.BlockSpec((None, 8, lane), lambda o, j: (o, 0, 0)),
            scratch_shapes=[pltpu.VMEM((acc_rows, hw_tile), jnp.float32)],
        ),
        compiler_params=pltpu.CompilerParams(
            dimension_semantics=("parallel", "arbitrary"),
            vmem_limit_bytes=vmem_limit,
        ),
    )(s3, w_mat, t3)

    return jnp.sum(out[:, 0, 0]) / jnp.float32(total_count)


# --------------------------------------------------------------------------
# 2-D (N, C) path (no wrapper transpose: tile N on the sublane axis)
# --------------------------------------------------------------------------
def _fitnet_kernel_2d(s_ref, w_ref, t_ref, out_ref, acc_ref, *,
                      tile_n, n_valid, needs_mask):
    i = pl.program_id(0)

    @pl.when(i == 0)
    def _():
        acc_ref[...] = jnp.zeros_like(acc_ref)

    # (tile_n, Cin) @ (Cin, Cout) on the MXU, f32 accumulation.
    proj = jnp.dot(s_ref[...], w_ref[...], preferred_element_type=jnp.float32)
    diff = proj - t_ref[...].astype(jnp.float32)
    sq = diff * diff

    if needs_mask:
        row = i * tile_n + jax.lax.broadcasted_iota(jnp.int32, sq.shape, 0)
        sq = jnp.where(row < n_valid, sq, 0.0)

    acc_ref[...] += sq

    @pl.when(i == pl.num_programs(0) - 1)
    def _():
        out_ref[...] = jnp.broadcast_to(jnp.sum(acc_ref[...]), out_ref.shape)


def _fitnet_loss_2d(student, teacher, weight):
    n, cin = student.shape
    cout = teacher.shape[1]
    # Tiny (Cin, Cout) weight; transposing it is negligible (not an HBM pass).
    w_mat = weight.reshape(cout, cin).T.astype(student.dtype)

    if n <= 8:
        tile_n = n
    else:
        tile_n = min(1024, (n // 8) * 8)
    num_tiles = pl.cdiv(n, tile_n)
    needs_mask = (num_tiles * tile_n != n)

    _, limit_cap = _vmem_caps()
    vmem_limit = int(min(32 << 20, limit_cap))

    kernel = functools.partial(_fitnet_kernel_2d, tile_n=tile_n,
                               n_valid=n, needs_mask=needs_mask)

    out = pl.pallas_call(
        kernel,
        out_shape=jax.ShapeDtypeStruct((8, 128), jnp.float32),
        grid_spec=pltpu.PrefetchScalarGridSpec(
            num_scalar_prefetch=0,
            grid=(num_tiles,),
            in_specs=[
                pl.BlockSpec((tile_n, cin), lambda i: (i, 0)),
                pl.BlockSpec((cin, cout), lambda i: (0, 0)),
                pl.BlockSpec((tile_n, cout), lambda i: (i, 0)),
            ],
            out_specs=pl.BlockSpec((8, 128), lambda i: (0, 0)),
            scratch_shapes=[pltpu.VMEM((tile_n, cout), jnp.float32)],
        ),
        compiler_params=pltpu.CompilerParams(
            dimension_semantics=("arbitrary",),
            vmem_limit_bytes=vmem_limit,
        ),
    )(student, w_mat, teacher)

    return out[0, 0] / jnp.float32(n * cout)


# --------------------------------------------------------------------------
# Public entry point (matches FitNet.forward semantics)
# --------------------------------------------------------------------------
def fitnet_loss(student, teacher, weight, *, tile_hw=4096, vmem_budget=None):
    """student: (N, Cin, H, W) or (N, Cin); teacher: (N, Cout, H, W) or (N, Cout).

    weight: conv weight of shape (Cout, Cin, 1, 1) (PyTorch Conv2d layout).
    Returns scalar mean((conv1x1(student) - teacher)^2).
    """
    if student.ndim == 2:
        return _fitnet_loss_2d(student, teacher, weight)
    return _fitnet_loss_4d(student, teacher, weight, tile_hw, vmem_budget)


def reference_fitnet_loss(student, teacher, weight):
    if student.ndim == 2:
        student = student[:, :, None, None]
        teacher = teacher[:, :, None, None]
    cout, cin = weight.shape[0], weight.shape[1]
    w_mat = weight.reshape(cout, cin)
    proj = jnp.einsum("nchw,oc->nohw", student, w_mat)
    return jnp.mean((proj - teacher) ** 2)


if __name__ == "__main__":
    key = jax.random.PRNGKey(0)
    k_w, k_s, k_t = jax.random.split(key, 3)

    batch, in_feature, out_feature, spatial = 2, 4, 8, 16

    # Deterministic init matching nn.Conv2d(in, out, 1, bias=False)
    # with weight.data.uniform_(-0.005, 0.005).
    weight = jax.random.uniform(
        k_w, (out_feature, in_feature, 1, 1),
        minval=-0.005, maxval=0.005, dtype=jnp.float32)

    student = jax.random.normal(
        k_s, (batch, in_feature, spatial, spatial), dtype=jnp.float32)
    teacher = jax.random.normal(
        k_t, (batch, out_feature, spatial, spatial), dtype=jnp.float32)

    # 1) Base 4-D case.
    loss = jax.block_until_ready(fitnet_loss(student, teacher, weight))
    ref = reference_fitnet_loss(student, teacher, weight)
    assert jnp.allclose(loss, ref, rtol=1e-5, atol=1e-6), (loss, ref)

    # 2) Ragged spatial tail (in-kernel masking path, no wrapper jnp.pad).
    k1, k2 = jax.random.split(k_s)
    s_r = jax.random.normal(k1, (2, in_feature, 12, 12), dtype=jnp.float32)
    t_r = jax.random.normal(k2, (2, out_feature, 12, 12), dtype=jnp.float32)
    loss_r = jax.block_until_ready(fitnet_loss(s_r, t_r, weight))
    ref_r = reference_fitnet_loss(s_r, t_r, weight)
    assert jnp.allclose(loss_r, ref_r, rtol=1e-5, atol=1e-6), (loss_r, ref_r)

    # 3) batch == 1 with an even tile count (spatial-split "parallel" path).
    k3, k4 = jax.random.split(k_t)
    s_1 = jax.random.normal(k3, (1, in_feature, 16, 32), dtype=jnp.float32)
    t_1 = jax.random.normal(k4, (1, out_feature, 16, 32), dtype=jnp.float32)
    loss_1 = jax.block_until_ready(fitnet_loss(s_1, t_1, weight, tile_hw=256))
    ref_1 = reference_fitnet_loss(s_1, t_1, weight)
    assert jnp.allclose(loss_1, ref_1, rtol=1e-5, atol=1e-6), (loss_1, ref_1)

    # 4) Cout > 8 (sublane-folded accumulator path).
    k5, k6, k7 = jax.random.split(k1, 3)
    weight16 = jax.random.uniform(
        k5, (16, in_feature, 1, 1), minval=-0.005, maxval=0.005,
        dtype=jnp.float32)
    t_16 = jax.random.normal(k6, (2, 16, spatial, spatial), dtype=jnp.float32)
    loss_f = jax.block_until_ready(fitnet_loss(student, t_16, weight16))
    ref_f = reference_fitnet_loss(student, t_16, weight16)
    assert jnp.allclose(loss_f, ref_f, rtol=1e-5, atol=1e-6), (loss_f, ref_f)

    # 5) 2-D (N, C) path (no wrapper transpose).
    s_2d = jax.random.normal(k7, (10, in_feature), dtype=jnp.float32)
    t_2d = jax.random.normal(k2, (10, out_feature), dtype=jnp.float32)
    loss_2d = jax.block_until_ready(fitnet_loss(s_2d, t_2d, weight))
    ref_2d = reference_fitnet_loss(s_2d, t_2d, weight)
    assert jnp.allclose(loss_2d, ref_2d, rtol=1e-5, atol=1e-6), (loss_2d, ref_2d)

    print("KERNEL_OK")
</pallas_src>

<mosaic_0001>
module attributes {stable_mosaic.version = 11 : i64} {
  func.func @_fitnet_kernel_4d(%arg0: i32, %arg1: i32, %arg2: memref<1x4x256xf32, #tpu.memory_space<vmem>>, %arg3: memref<8x4xf32, #tpu.memory_space<vmem>>, %arg4: memref<1x8x256xf32, #tpu.memory_space<vmem>>, %arg5: memref<1x8x128xf32, #tpu.memory_space<vmem>>, %arg6: memref<8x256xf32, #tpu.memory_space<vmem>>) attributes {dimension_semantics = [#tpu.dimension_semantics<parallel>, #tpu.dimension_semantics<arbitrary>], iteration_bounds = array<i64: 2, 1>, scalar_prefetch = 0 : i64, scratch_operands = 1 : i64, tpu.core_type = #tpu.core_type<tc>, window_params = [{transform_indices = @transform_0, window_bounds = array<i64: 1, 4, 256>}, {pipeline_mode = #tpu.pipeline_mode<synchronous>, transform_indices = @transform_1, window_bounds = array<i64: 8, 4>}, {transform_indices = @transform_2, window_bounds = array<i64: 1, 8, 256>}, {transform_indices = @transform_3, window_bounds = array<i64: 1, 8, 128>}]} {
    %c0_i32 = arith.constant 0 : i32
    %0 = arith.cmpi eq, %arg1, %c0_i32 : i32
    %1 = arith.extui %0 : i1 to i32
    %c0_i32_0 = arith.constant 0 : i32
    %2 = arith.cmpi ne, %1, %c0_i32_0 : i32
    scf.if %2 {
      %cst_14 = arith.constant 0.000000e+00 : f32
      %17 = vector.broadcast %cst_14 : f32 to vector<8x256xf32>
      %c0_15 = arith.constant 0 : index
      %c0_16 = arith.constant 0 : index
      %18 = vector.load %arg6[%c0_15, %c0_16] : memref<8x256xf32, #tpu.memory_space<vmem>>, vector<8x256xf32>
      tpu.vector_store %arg6[%c0_15, %c0_16], %17 {strides = array<i32>} : memref<8x256xf32, #tpu.memory_space<vmem>>, vector<8x256xf32>,
    } else {
    }
    %c0 = arith.constant 0 : index
    %c0_1 = arith.constant 0 : index
    %3 = vector.load %arg3[%c0, %c0_1] : memref<8x4xf32, #tpu.memory_space<vmem>>, vector<8x4xf32>
    %c0_2 = arith.constant 0 : index
    %c0_3 = arith.constant 0 : index
    %c0_4 = arith.constant 0 : index
    %4 = vector.load %arg2[%c0_2, %c0_3, %c0_4] : memref<1x4x256xf32, #tpu.memory_space<vmem>>, vector<1x4x256xf32>
    %5 = vector.shape_cast %4 : vector<1x4x256xf32> to vector<4x256xf32>
    %cst = arith.constant dense<0.000000e+00> : vector<8x256xf32>
    %6 = tpu.matmul %3, %5, %cst {dimension_numbers = #tpu.dot_dimension_numbers<[1], [0], [0], [1], [0, 0, 1, 1], [], []>} : vector<8x4xf32>, vector<4x256xf32>, vector<8x256xf32> -> vector<8x256xf32>
    %c0_5 = arith.constant 0 : index
    %c0_6 = arith.constant 0 : index
    %c0_7 = arith.constant 0 : index
    %7 = vector.load %arg4[%c0_5, %c0_6, %c0_7] : memref<1x8x256xf32, #tpu.memory_space<vmem>>, vector<1x8x256xf32>
    %8 = vector.shape_cast %7 : vector<1x8x256xf32> to vector<8x256xf32>
    %9 = arith.subf %6, %8 : vector<8x256xf32>
    %10 = arith.mulf %9, %9 : vector<8x256xf32>
    %c0_8 = arith.constant 0 : index
    %c0_9 = arith.constant 0 : index
    %11 = vector.load %arg6[%c0_8, %c0_9] : memref<8x256xf32, #tpu.memory_space<vmem>>, vector<8x256xf32>
    %12 = arith.addf %11, %10 : vector<8x256xf32>
    %c0_10 = arith.constant 0 : index
    %c0_11 = arith.constant 0 : index
    %13 = vector.load %arg6[%c0_10, %c0_11] : memref<8x256xf32, #tpu.memory_space<vmem>>, vector<8x256xf32>
    tpu.vector_store %arg6[%c0_10, %c0_11], %12 {strides = array<i32>} : memref<8x256xf32, #tpu.memory_space<vmem>>, vector<8x256xf32>,
    %c0_i32_12 = arith.constant 0 : i32
    %14 = arith.cmpi eq, %arg1, %c0_i32_12 : i32
    %15 = arith.extui %14 : i1 to i32
    %c0_i32_13 = arith.constant 0 : i32
    %16 = arith.cmpi ne, %15, %c0_i32_13 : i32
    scf.if %16 {
      %c0_14 = arith.constant 0 : index
      %c0_15 = arith.constant 0 : index
      %17 = vector.load %arg6[%c0_14, %c0_15] : memref<8x256xf32, #tpu.memory_space<vmem>>, vector<8x256xf32>
      %18 = vector.shape_cast %17 : vector<8x256xf32> to vector<1x8x256xf32>
      %cst_16 = arith.constant dense<0.000000e+00> : vector<1xf32>
      %19 = vector.multi_reduction <add>, %18, %cst_16 [1, 2] : vector<1x8x256xf32> to vector<1xf32>
      %20 = vector.shape_cast %19 : vector<1xf32> to vector<1x1x1xf32>
      %21 = vector.extract %20[0, 0, 0] : f32 from vector<1x1x1xf32>
      %22 = vector.broadcast %21 : f32 to vector<8x128xf32>
      %c0_17 = arith.constant 0 : index
      %c0_18 = arith.constant 0 : index
      %c0_19 = arith.constant 0 : index
      %23 = vector.load %arg5[%c0_17, %c0_18, %c0_19] : memref<1x8x128xf32, #tpu.memory_space<vmem>>, vector<1x8x128xf32>
      %24 = vector.shape_cast %23 : vector<1x8x128xf32> to vector<8x128xf32>
      %25 = vector.shape_cast %22 : vector<8x128xf32> to vector<1x8x128xf32>
      tpu.vector_store %arg5[%c0_17, %c0_18, %c0_19], %25 {strides = array<i32>} : memref<1x8x128xf32, #tpu.memory_space<vmem>>, vector<1x8x128xf32>,
    } else {
    }
    return
  }
  func.func @transform_0(%arg0: i32, %arg1: i32) -> (i32, i32, i32) {
    %c0_i32 = arith.constant 0 : i32
    %c0_i32_0 = arith.constant 0 : i32
    return %arg0, %c0_i32, %arg1 : i32, i32, i32
  }
  func.func @transform_1(%arg0: i32, %arg1: i32) -> (i32, i32) {
    %c0_i32 = arith.constant 0 : i32
    %c0_i32_0 = arith.constant 0 : i32
    %c0_i32_1 = arith.constant 0 : i32
    return %c0_i32, %c0_i32_0 : i32, i32
  }
  func.func @transform_2(%arg0: i32, %arg1: i32) -> (i32, i32, i32) {
    %c0_i32 = arith.constant 0 : i32
    %c0_i32_0 = arith.constant 0 : i32
    return %arg0, %c0_i32, %arg1 : i32, i32, i32
  }
  func.func @transform_3(%arg0: i32, %arg1: i32) -> (i32, i32, i32) {
    %c0_i32 = arith.constant 0 : i32
    %c0_i32_0 = arith.constant 0 : i32
    %c0_i32_1 = arith.constant 0 : i32
    return %arg0, %c0_i32, %c0_i32_0 : i32, i32, i32
  }
}

</mosaic_0001>

<bundles_post_ra>
// kernel: tpu_custom_call.1
= control target key start
LH: loop header
LB: loop body
LE: loop exit
PB: predicated region body
PF: predicated region fallthrough
CT: control target
= control target key end

     0   :  { %8 = vsyncpa [#allocation4], 0  ;;  %s870_s0 = inlined_call_operand.hbm [shape: f32[2,4,256], index: 0, kind: input, shape index: {}]   ;;  %s871_s1 = inlined_call_operand.vmem [shape: f32[8,4], index: 1, kind: input, shape index: {}]   ;;  %s872_s2 = inlined_call_operand.hbm [shape: f32[2,8,256], index: 2, kind: input, shape index: {}]   ;;  %s873_s3 = inlined_call_operand.hbm [shape: f32[2,8,128], index: 3, kind: output, shape index: {}]  }
   0x1   :  { %10 = vsyncpa [#allocation4 + $0x1], 0 }
   0x2   :  { %11 = vsyncpa [#allocation7], 0 }
   0x3   :  { %13 = vsyncpa [#allocation7 + $0x1], 0 }
   0x4   :  { %14 = vsyncpa [#allocation5], 0 }
   0x5   :  { %16 = vsyncpa [#allocation5 + $0x1], 0  ;;  %s725_s12 = smov 0   ;;  %s727_s13 = smov 0  }
   0x6   :  { %s729_s14 = smov 0   ;;  %s731_s15 = smov 0  }
   0x7   :  { %s733_s16 = smov 0   ;;  %s735_s17 = smov 0  }
   0x8 LB: > { %s464_s18 = sadd.s32 4294967295, %s703_s17   ;;  %s465_s19 = sadd.s32 4294967294, %s703_s17   ;;  %s703_s17 = sphi %s735_s17, %s22_s17   ;;  %s699_s16 = sphi %s733_s16, %s883_s16   ;;  %s695_s15 = sphi %s731_s15, %s882_s15   ;;  %s691_s14 = sphi %s729_s14, %s881_s14   ;;  %s687_s13 = sphi %s727_s13, %s880_s13   ;;  %s683_s12 = sphi %s725_s12, %s879_s12  }
   0x9   : > { %s34_s20 = sadd.s32 1, %s699_s16  ;;  %s43_s21 = sadd.s32 1, %s691_s14 }
   0xa   : > { %p36_p0 = scmp.ge.s32.totalorder %s34_s20, 2  ;;  %p50_p1 = scmp.ne.s32.totalorder %s691_s14, %s687_s13 }
   0xb   : > { %p51_p2 = scmp.eq.s32.totalorder %s703_s17, 0  ;;  %p56_p3 = scmp.ne.s32.totalorder %s687_s13, %s683_s12 }
   0xc   : > { %s885_s20 = smov (%p36_p0, %s34_s20), 0  ;;  %p57_p5 = scmp.eq.s32.totalorder %s464_s18, 0 }
   0xd   : > { %p766_p4 = por %p51_p2, %p50_p1  ;;  %s38_s23 = ssub.s32 %s699_s16, %s885_s20 }
   0xe   : > { %p129_p6 = scmp.eq.s32.totalorder %s464_s18, 1  ;;  %p41_p7 = scmp.eq.s32.totalorder %s38_s23, 0 }
   0xf   : > { %p772_p8 = por %p57_p5, %p56_p3  ;;  %p135_p10 = scmp.eq.s32.totalorder %s465_s19, 1 }
  0x10   : > { %p776_p9 = por %p129_p6, %p50_p1  ;;  %p467_p12 = scmp.ge.s32.totalorder %s703_s17, 2 }
  0x11   : > { %s781_s26 = scalar_select %p41_p7, %s691_s14, %s43_s21  }
  0x12   : > { %p783_p11 = por %p135_p10, %p56_p3  ;;  %p507_p13 = scmp.lt.s32.totalorder %s703_s17, 2 }
  0x13   : > { %s158_s28 = sand.u32 1, %s691_s14   ;;  %s486_s30 = sshll.u32 %s699_s16, 3 }
  0x14   : > { %s468_s29 = sshll.u32 %s158_s28, 3  ;;  %s169_s6 = scalar_lea.hbm %s870_s0, %s486_s30 }
  0x15   : > { %s162_s7 = scalar_lea.vmem [#allocation3], %s468_s29  ;;  %s171_s9 = sshll.u32 %s169_s6, 4  ;;  %s172_s9 = int_to_ptr.hbm [resolvable:$true] %s171_s9 }
  0x16   : > { %s173_s8 = sshll.u32 %s162_s7, 4  ;;  %p796_p0 = pnand %p507_p13, %p766_p4  ;;  %s174_s8 = int_to_ptr.vmem [resolvable:$true] %s173_s8 }
  0x17   : > { %p474_p1 = scmp.ge.s32.totalorder %s703_s17, 1  ;;  %p200_p2 = scmp.lt.s32.totalorder %s703_s17, 3 }
  0x18   : > { %s159_s11 = scalar_lea.sflag [#allocation4], %s158_s28  ;;  %s471_s18 = sshll.u32 %s158_s28, 4 }
  0x19   : > { %499 = dma.hbm_to_vmem [thread:$0]  (!%p796_p0), %s172_s9, 128, %s174_s8, %s159_s11  }
  0x1a   : > { %p201_p3 = pnand %p474_p1, %p200_p2  ;;  %s487_s19 = sshll.u32 %s699_s16, 4 }
  0x1b   : > { %s191_s29 = scalar_lea.hbm %s872_s2, %s487_s19  ;;  %s184_s30 = scalar_lea.vmem [#allocation6], %s471_s18 }
  0x1c   : > { %s195_s22 = sshll.u32 %s184_s30, 4  ;;  %s193_s4 = sshll.u32 %s191_s29, 4  ;;  %s196_s22 = int_to_ptr.vmem [resolvable:$true] %s195_s22  ;;  %s194_s4 = int_to_ptr.hbm [resolvable:$true] %s193_s4 }
  0x1d   : > { %s181_s5 = scalar_lea.sflag [#allocation7], %s158_s28  ;;  %204 = sbr.rel (%p201_p3) target bundleno = 362 (0x16a), region = 32 }
  0x1e   : > { %502 = dma.hbm_to_vmem [thread:$0]  (!%p796_p0), %s194_s4, 256, %s196_s22, %s181_s5  }
  0x1f   : > { %s811_s6 = sand.u32 (!%p201_p3), 1, %s687_s13  }
  0x20   : > { %s475_s7 = sshll.u32 (!%p201_p3), %s811_s6, 3  ;;  %s207_s8 = scalar_lea.sflag (!%p201_p3), [#allocation4], %s811_s6 }
  0x21   : > { %s210_s9 = scalar_lea.vmem (!%p201_p3), [#allocation3], %s475_s7 }
  0x22   : > { %670 = dma.done.wait (%p772_p8), %s207_s8, 128  }
  0x23   : > { %672 = vsyncadd (%p772_p8), %s207_s8, 4294967168  ;;  %s476_s28 = sshll.u32 %s811_s6, 4  ;;  %s217_s10 = scalar_lea.sflag [#allocation7], %s811_s6 }
  0x24   : > { %s220_s11 = scalar_lea.vmem [#allocation6], %s476_s28 }
  0x25   : > { %674 = dma.done.wait (%p772_p8), %s217_s10, 256  }
  0x26   : > { %676 = vsyncadd (%p772_p8), %s217_s10, 4294967040  ;;  %v258_v0 = vld [vmem:[%s210_s9] sm:$0xff]  ;;  %vm267_vm0 = vcmask 1043456   ;;  %v257_v1 = vld [vmem:[%s871_s1] sm:$0xff]  ;;  %vm263_vm1 = vcmask 31744   ;;  %s483_s24 = sshll.u32 %s695_s15, 3 }
  0x27   : > { %260 = vst [vmem:[#allocation1] ss:$2 sm:$0xff] %v258_v0  ;;  %v312_v4 = vld [vmem:[%s220_s11] sm:$0xff]  ;;  %v313_v5 = vld [vmem:[%s220_s11 + $0x8] sm:$0xff]  ;;  %s352_s29 = scalar_lea.hbm %s873_s3, %s483_s24  ;;  %s248_s30 = scalar_lea.vmem [#allocation8], %s475_s7 }
  0x28   : > { %s354_s22 = sshll.u32 %s248_s30, 4  ;;  %s356_s4 = sshll.u32 %s352_s29, 4  ;;  %s355_s22 = int_to_ptr.vmem [resolvable:$true] %s354_s22  ;;  %s357_s4 = int_to_ptr.hbm [resolvable:$true] %s356_s4 }
  0x29   : > { %s342_s8 = scalar_lea.sflag [#allocation5], %s811_s6  ;;  %s631_s9 = sshra.s32 %s357_s4, 4  ;;  %s632_s9 = int_to_ptr.hbm [resolvable:$true] %s631_s9 }
  0x2a   : > { %s633_s28 = scalar_lea.hbm %s632_s9, 8  ;;  %s637_s11 = scalar_lea.hbm %s873_s3, 16 }
  0x2b   : > { %p634_p4 = scmp.ne.s32.totalorder %s632_s9, %s633_s28  ;;  %p638_p7 = scmp.lt.s32.totalorder %s632_s9, %s873_s3 }
  0x2c   : > { %p639_p8 = scmp.lt.s32.totalorder %s637_s11, %s633_s28 }
  0x2d   : > { %p635_p5 = pnand %p634_p4, %p776_p9 }
  0x2e   : > { %v261_v2 = vld.sshfl [vmem:[#allocation1] sm:$0xff pattern:$0x75316420]  ;;  %v262_v3 = vld.sshfl [vmem:[#allocation1 + $0x8] sm:$0xff pattern:$0x75316420]  ;;  %p640_p10 = por %p639_p8, %p638_p7 }
  0x2f   : > { %478 = vmatpush.msk.msra.mxu0 %vm267_vm0, %v261_v2  ;;  %480 = vmatpush.msk.msra.mxu1 %vm267_vm0, %v262_v3  ;;  %p636_p6 = pneg %p635_p5 }
  0x30   : > { %479 = vmatmul.msk.f32.vlgmr.msra.gmra.mxu0 %vm263_vm1, %v257_v1  ;;  %481 = vmatmul.msk.f32.vlgmr.msra.gmra.mxu1 %vm263_vm1, %v257_v1 }
  0x31   : > { %p641_p13 = pnand %p640_p10, %p636_p6 }
  0xad   : > { %v289_v6 = vpop.f32.mrf.mxu0  ;;  %v309_v7 = vpop.f32.mrf.mxu1 }
  0xae   : > { %v314_v8 = vsub.f32 %v289_v6, %v312_v4  ;;  %v315_v9 = vsub.f32 %v309_v7, %v313_v5 }
  0xb0   : > { %v316_v10 = vmul.f32 %v314_v8, %v314_v8  ;;  %v317_v11 = vmul.f32 %v315_v9, %v315_v9 }
  0xb2   : > { %v329_v12 = vadd.f32 %v317_v11, %v316_v10 }
  0xb4   : > { %330 = vadd.xlane.f32.xlu0 %v329_v12 }
 0x127   : > { %v331_v13 = vpop.xlane.xlu0 %330 }
 0x128   : > { %v332_v14 = vrot.slane %v331_v13, 4 }
 0x12a   : > { %v333_v15 = vadd.f32 %v332_v14, %v331_v13 }
 0x12c   : > { %v334_v16 = vrot.slane %v333_v15, 2 }
 0x12e   : > { %v335_v17 = vadd.f32 %v334_v16, %v333_v15 }
 0x130   : > { %v336_v18 = vrot.slane %v335_v17, 1 }
 0x132   : > { %v337_v19 = vadd.f32 %v336_v18, %v335_v17 }
 0x134   : > { %488 = vpush %v337_v19 }
 0x165   : > { %s489_s5 = spop %488 }
 0x166   : > { %v339_v20 = vstv %s489_s5 }
 0x167   : > { %340 = vst [vmem:[%s248_s30] sm:$0xff] %v339_v20 }
 0x168   : > { %644 = shalt.err (!%p641_p13)
}
 0x169   : > { %494 = dma.vmem_to_hbm [thread:$0]  (%p776_p9), %s355_s22, 128, %s357_s4, %s342_s8  }
 0x16a PF: > { %s368_s6 = sand.u32 1, %s683_s12   ;;  %p504_p0 = pnand %p467_p12, %p783_p11 }
 0x16b   : > { %s369_s19 = scalar_lea.sflag [#allocation5], %s368_s6 }
 0x16c   : > { %p505_p1 = pneg %p504_p0 }
 0x16e   : > { %678 = dma.done.wait (%p505_p1), %s369_s19, 128  }
 0x16f   : > { %680 = vsyncadd (%p505_p1), %s369_s19, 4294967168  ;;  %s22_s17 = sadd.s32 1, %s703_s17   ;;  %s879_s12 = smov %s687_s13 }
 0x170   : > { %p19_p2 = scmp.ge.s32.totalorder %s22_s17, 4   ;;  %s880_s13 = smov %s691_s14 }
 0x171   : > { %s881_s14 = smov %s781_s26  ;;  %s882_s15 = smov %s699_s16 }
 0x172   : > { %s883_s16 = smov %s885_s20  ;;  %21 = sbr.rel (!%p19_p2) target bundleno = 8 (0x8), region = 98 }
 0x177   :  { %375 = vsyncpa [#allocation4], 1 }
 0x178   :  { %377 = vsyncpa [#allocation4 + $0x1], 1 }
 0x179   :  { %378 = vsyncpa [#allocation7], 1 }
 0x17a   :  { %380 = vsyncpa [#allocation7 + $0x1], 1 }
 0x17b   :  { %381 = vsyncpa [#allocation5], 1 }
 0x17c   :  { %383 = vsyncpa [#allocation5 + $0x1], 1 }

</bundles_post_ra>
